<compile_context>
chip_gen: v6e
topology: v6e:2x2x1
jax: 0.10.0
libtpu: 0.0.40
codegen_flags: <defaults>
</compile_context>

<pallas_src>
import functools

import jax
import jax.numpy as jnp
from jax.experimental import pallas as pl
from jax.experimental.pallas import tpu as pltpu


_MAX_TILE_SUBLANES = 1024                 # 131072 voxels per grid step
_VMEM_TILE_BUDGET = 18 * 1024 * 1024      # bytes reserved for tiles + accums


def _dice_reduce_kernel(pred_ref, tgt_ref,
                        inter_ref, psum_ref, tsum_ref,
                        inter_acc, psum_acc, tsum_acc,
                        *, m_valid, tile_voxels, n_inner, n_outer, has_tail):
    """One grid step: (C, S_tile, 128) logits + (1, S_tile, 128) targets ->
    running (C, S_tile, 128) partial sums; finalize to (C, 128) outputs."""
    o = pl.program_id(1)
    i = pl.program_id(2)

    @pl.when(i == 0)
    def _init():
        inter_acc[...] = jnp.zeros_like(inter_acc)
        psum_acc[...] = jnp.zeros_like(psum_acc)
        tsum_acc[...] = jnp.zeros_like(tsum_acc)

    logits = pred_ref[...].astype(jnp.float32)            # (C, S_tile, 128)
    tgt = tgt_ref[...]                                     # (1, S_tile, 128)

    # Softmax over the class axis (leading dim -> plain per-vreg elementwise
    # ops across C registers).  Exact division for the denominator.
    mx = jnp.max(logits, axis=0, keepdims=True)
    e = jnp.exp(logits - mx)
    probs = e / jnp.sum(e, axis=0, keepdims=True)          # (C, S_tile, 128)

    # In-kernel one-hot of the targets.
    class_ids = jax.lax.broadcasted_iota(jnp.int32, logits.shape, 0)
    onehot = (tgt == class_ids).astype(jnp.float32)        # (C, S_tile, 128)

    def _accumulate(p, t):
        inter_acc[...] += p * t
        psum_acc[...] += p
        tsum_acc[...] += t

    if has_tail:
        # Only the single last tile carries pad / out-of-range voxels; every
        # other step runs the unmasked fast path (no iota / compare / select
        # in the steady state).
        is_last = jnp.logical_and(o == n_outer - 1, i == n_inner - 1)

        @pl.when(jnp.logical_not(is_last))
        def _steady():
            _accumulate(probs, onehot)

        @pl.when(is_last)
        def _tail():
            shp = (1,) + logits.shape[1:]                  # (1, S_tile, 128)
            sub = jax.lax.broadcasted_iota(jnp.int32, shp, 1)
            lane = jax.lax.broadcasted_iota(jnp.int32, shp, 2)
            start = (o * n_inner + i) * tile_voxels
            valid = (start + sub * 128 + lane) < m_valid   # (1, S_tile, 128)
            _accumulate(jnp.where(valid, probs, 0.0),
                        jnp.where(valid, onehot, 0.0))
    else:
        _accumulate(probs, onehot)

    @pl.when(i == n_inner - 1)
    def _finalize():
        # Reduce over sublanes once per (batch, outer) group -> lane-dense
        # (C, 128) writeback instead of (C, S_tile, 128).
        inter_ref[...] = jnp.sum(inter_acc[...], axis=1)
        psum_ref[...] = jnp.sum(psum_acc[...], axis=1)
        tsum_ref[...] = jnp.sum(tsum_acc[...], axis=1)


@functools.partial(jax.jit, static_argnames=("smooth",))
def dice_loss(predictions, targets, smooth=1.0):
    """predictions: (N, C, D, H, W) float logits; targets: (N, D, H, W) int."""
    n, c, d, h, w = predictions.shape
    m = d * h * w

    pred = predictions.reshape(n, c, m)
    tgt = targets.astype(jnp.int32).reshape(n, m)

    # Pad the voxel axis to a lane multiple only if needed (typical volumes
    # are already multiples of 128); pad voxels are masked in-kernel.
    m_pad = ((m + 127) // 128) * 128
    if m_pad != m:
        pred = jnp.pad(pred, ((0, 0), (0, 0), (0, m_pad - m)))
        tgt = jnp.pad(tgt, ((0, 0), (0, m_pad - m)))
    s_total = m_pad // 128
    pred = pred.reshape(n, c, s_total, 128)
    tgt = tgt.reshape(n, 1, s_total, 128)

    # VMEM-aware tile: pred double-buffer + tgt double-buffer + 3 accumulators.
    itemsize = jnp.dtype(predictions.dtype).itemsize
    per_sublane = 128 * (2 * c * itemsize + 2 * 4 + 3 * c * 4)
    s_tile = int(_VMEM_TILE_BUDGET // per_sublane) // 8 * 8
    s_tile = max(8, min(s_tile, _MAX_TILE_SUBLANES))
    if s_tile >= s_total:
        s_tile = s_total                                   # full-dim block
    num_tiles = -(-s_total // s_tile)

    # Give the second TensorCore (v7x megacore) work when the batch is 1.
    n_outer = 2 if (n == 1 and num_tiles >= 2 and num_tiles % 2 == 0) else 1
    n_inner = num_tiles // n_outer

    tile_voxels = s_tile * 128
    has_tail = (num_tiles * tile_voxels) != m

    kernel = functools.partial(
        _dice_reduce_kernel, m_valid=m, tile_voxels=tile_voxels,
        n_inner=n_inner, n_outer=n_outer, has_tail=has_tail)

    cost = pl.CostEstimate(
        flops=int(8 * n * c * m),
        transcendentals=int(n * c * m),
        bytes_accessed=int(n * m * (c * itemsize + 4)
                           + 3 * n * n_outer * c * 128 * 4),
    )

    acc_out_shape = jax.ShapeDtypeStruct((n * n_outer, c, 128), jnp.float32)
    acc_out_spec = pl.BlockSpec((None, c, 128),
                                lambda b, o, i: (b * n_outer + o, 0, 0))
    in_idx = lambda b, o, i: (b, 0, o * n_inner + i, 0)

    inter, psum, tsum = pl.pallas_call(
        kernel,
        out_shape=(acc_out_shape, acc_out_shape, acc_out_shape),
        grid_spec=pltpu.PrefetchScalarGridSpec(
            num_scalar_prefetch=0,
            grid=(n, n_outer, n_inner),
            in_specs=[
                pl.BlockSpec((None, c, s_tile, 128), in_idx),
                pl.BlockSpec((None, 1, s_tile, 128), in_idx),
            ],
            out_specs=[acc_out_spec, acc_out_spec, acc_out_spec],
            scratch_shapes=[pltpu.VMEM((c, s_tile, 128), jnp.float32)] * 3,
        ),
        compiler_params=pltpu.CompilerParams(
            dimension_semantics=("parallel", "parallel", "arbitrary"),
            vmem_limit_bytes=32 * 1024 * 1024,
        ),
        cost_estimate=cost,
    )(pred, tgt)

    # Tiny final combine in JAX: (N*n_outer, C, 128) -> (C,).
    inter = jnp.sum(inter, axis=(0, 2))
    psum = jnp.sum(psum, axis=(0, 2))
    tsum = jnp.sum(tsum, axis=(0, 2))
    dice = (2.0 * inter + smooth) / (psum + tsum + smooth)
    return 1.0 - jnp.mean(dice)


def dice_loss_ref(predictions, targets, smooth=1.0):
    """Pure-JAX reference mirroring the PyTorch module."""
    probs = jax.nn.softmax(predictions, axis=1)
    c = predictions.shape[1]
    onehot = jax.nn.one_hot(targets, c, dtype=jnp.float32)        # (N,D,H,W,C)
    onehot = jnp.transpose(onehot, (0, 4, 1, 2, 3))                # (N,C,D,H,W)
    dices = []
    for i in range(c):
        p = probs[:, i]
        t = onehot[:, i]
        inter = jnp.sum(p * t)
        dices.append((2.0 * inter + smooth) / (jnp.sum(p) + jnp.sum(t) + smooth))
    return 1.0 - jnp.mean(jnp.stack(dices))


if __name__ == "__main__":
    key = jax.random.PRNGKey(0)

    # Case 1: lane-aligned volume (D*H*W = 256), exercises the fast path.
    k1, k2, k3, k4 = jax.random.split(key, 4)
    N, C, D, H, W = 2, 4, 4, 8, 8
    predictions = jax.random.normal(k1, (N, C, D, H, W), dtype=jnp.float32)
    targets = jax.random.randint(k2, (N, D, H, W), 0, C, dtype=jnp.int32)
    loss = jax.block_until_ready(dice_loss(predictions, targets, smooth=1.0))
    ref = jax.block_until_ready(dice_loss_ref(predictions, targets, smooth=1.0))
    assert jnp.allclose(loss, ref, atol=1e-5, rtol=1e-5), (loss, ref)

    # Case 2: ragged volume (D*H*W = 105 < 128), exercises pad + tail mask.
    N2, C2, D2, H2, W2 = 2, 3, 3, 5, 7
    predictions2 = jax.random.normal(k3, (N2, C2, D2, H2, W2), dtype=jnp.float32)
    targets2 = jax.random.randint(k4, (N2, D2, H2, W2), 0, C2, dtype=jnp.int32)
    loss2 = jax.block_until_ready(dice_loss(predictions2, targets2, smooth=1.0))
    ref2 = jax.block_until_ready(dice_loss_ref(predictions2, targets2, smooth=1.0))
    assert jnp.allclose(loss2, ref2, atol=1e-5, rtol=1e-5), (loss2, ref2)

    print("KERNEL_OK")
</pallas_src>

<mosaic_0001>
module attributes {stable_mosaic.version = 11 : i64} {
  func.func @_dice_reduce_kernel(%arg0: i32, %arg1: i32, %arg2: i32, %arg3: memref<1x4x2x128xf32, #tpu.memory_space<vmem>>, %arg4: memref<1x1x2x128xi32, #tpu.memory_space<vmem>>, %arg5: memref<1x4x128xf32, #tpu.memory_space<vmem>>, %arg6: memref<1x4x128xf32, #tpu.memory_space<vmem>>, %arg7: memref<1x4x128xf32, #tpu.memory_space<vmem>>, %arg8: memref<4x2x128xf32, #tpu.memory_space<vmem>>, %arg9: memref<4x2x128xf32, #tpu.memory_space<vmem>>, %arg10: memref<4x2x128xf32, #tpu.memory_space<vmem>>) attributes {dimension_semantics = [#tpu.dimension_semantics<parallel>, #tpu.dimension_semantics<parallel>, #tpu.dimension_semantics<arbitrary>], iteration_bounds = array<i64: 2, 1, 1>, scalar_prefetch = 0 : i64, scratch_operands = 3 : i64, tpu.core_type = #tpu.core_type<tc>, window_params = [{transform_indices = @transform_0, window_bounds = array<i64: 1, 4, 2, 128>}, {transform_indices = @transform_1, window_bounds = array<i64: 1, 1, 2, 128>}, {transform_indices = @transform_2, window_bounds = array<i64: 1, 4, 128>}, {transform_indices = @transform_3, window_bounds = array<i64: 1, 4, 128>}, {transform_indices = @transform_4, window_bounds = array<i64: 1, 4, 128>}]} {
    %c0_i32 = arith.constant 0 : i32
    %0 = arith.cmpi eq, %arg2, %c0_i32 : i32
    %1 = arith.extui %0 : i1 to i32
    %c0_i32_0 = arith.constant 0 : i32
    %2 = arith.cmpi ne, %1, %c0_i32_0 : i32
    scf.if %2 {
      %cst_29 = arith.constant 0.000000e+00 : f32
      %34 = vector.broadcast %cst_29 : f32 to vector<4x2x128xf32>
      %c0_30 = arith.constant 0 : index
      %c0_31 = arith.constant 0 : index
      %c0_32 = arith.constant 0 : index
      %35 = vector.load %arg8[%c0_30, %c0_31, %c0_32] : memref<4x2x128xf32, #tpu.memory_space<vmem>>, vector<4x2x128xf32>
      tpu.vector_store %arg8[%c0_30, %c0_31, %c0_32], %34 {strides = array<i32>} : memref<4x2x128xf32, #tpu.memory_space<vmem>>, vector<4x2x128xf32>,
      %cst_33 = arith.constant 0.000000e+00 : f32
      %36 = vector.broadcast %cst_33 : f32 to vector<4x2x128xf32>
      %c0_34 = arith.constant 0 : index
      %c0_35 = arith.constant 0 : index
      %c0_36 = arith.constant 0 : index
      %37 = vector.load %arg9[%c0_34, %c0_35, %c0_36] : memref<4x2x128xf32, #tpu.memory_space<vmem>>, vector<4x2x128xf32>
      tpu.vector_store %arg9[%c0_34, %c0_35, %c0_36], %36 {strides = array<i32>} : memref<4x2x128xf32, #tpu.memory_space<vmem>>, vector<4x2x128xf32>,
      %cst_37 = arith.constant 0.000000e+00 : f32
      %38 = vector.broadcast %cst_37 : f32 to vector<4x2x128xf32>
      %c0_38 = arith.constant 0 : index
      %c0_39 = arith.constant 0 : index
      %c0_40 = arith.constant 0 : index
      %39 = vector.load %arg10[%c0_38, %c0_39, %c0_40] : memref<4x2x128xf32, #tpu.memory_space<vmem>>, vector<4x2x128xf32>
      tpu.vector_store %arg10[%c0_38, %c0_39, %c0_40], %38 {strides = array<i32>} : memref<4x2x128xf32, #tpu.memory_space<vmem>>, vector<4x2x128xf32>,
    } else {
    }
    %c0 = arith.constant 0 : index
    %c0_1 = arith.constant 0 : index
    %c0_2 = arith.constant 0 : index
    %c0_3 = arith.constant 0 : index
    %3 = vector.load %arg3[%c0, %c0_1, %c0_2, %c0_3] : memref<1x4x2x128xf32, #tpu.memory_space<vmem>>, vector<1x4x2x128xf32>
    %4 = vector.shape_cast %3 : vector<1x4x2x128xf32> to vector<4x2x128xf32>
    %c0_4 = arith.constant 0 : index
    %c0_5 = arith.constant 0 : index
    %c0_6 = arith.constant 0 : index
    %c0_7 = arith.constant 0 : index
    %5 = vector.load %arg4[%c0_4, %c0_5, %c0_6, %c0_7] : memref<1x1x2x128xi32, #tpu.memory_space<vmem>>, vector<1x1x2x128xi32>
    %6 = vector.shape_cast %5 : vector<1x1x2x128xi32> to vector<1x2x128xi32>
    %cst = arith.constant dense<0xFF800000> : vector<2x128xf32>
    %7 = vector.multi_reduction <maximumf>, %4, %cst [0] : vector<4x2x128xf32> to vector<2x128xf32>
    %8 = vector.shape_cast %7 : vector<2x128xf32> to vector<1x2x128xf32>
    %9 = vector.broadcast %8 : vector<1x2x128xf32> to vector<4x2x128xf32>
    %10 = arith.subf %4, %9 : vector<4x2x128xf32>
    %11 = math.exp %10 : vector<4x2x128xf32>
    %cst_8 = arith.constant dense<0.000000e+00> : vector<2x128xf32>
    %12 = vector.multi_reduction <add>, %11, %cst_8 [0] : vector<4x2x128xf32> to vector<2x128xf32>
    %13 = vector.shape_cast %12 : vector<2x128xf32> to vector<1x2x128xf32>
    %14 = vector.broadcast %13 : vector<1x2x128xf32> to vector<4x2x128xf32>
    %15 = arith.divf %11, %14 : vector<4x2x128xf32>
    %16 = tpu.iota {dimensions = array<i32: 0>} : vector<4x2x128xi32>
    %17 = vector.broadcast %6 : vector<1x2x128xi32> to vector<4x2x128xi32>
    %18 = arith.cmpi eq, %17, %16 : vector<4x2x128xi32>
    %19 = arith.extui %18 : vector<4x2x128xi1> to vector<4x2x128xi32>
    %20 = arith.sitofp %19 : vector<4x2x128xi32> to vector<4x2x128xf32>
    %c0_9 = arith.constant 0 : index
    %c0_10 = arith.constant 0 : index
    %c0_11 = arith.constant 0 : index
    %21 = vector.load %arg8[%c0_9, %c0_10, %c0_11] : memref<4x2x128xf32, #tpu.memory_space<vmem>>, vector<4x2x128xf32>
    %22 = arith.mulf %15, %20 : vector<4x2x128xf32>
    %23 = arith.addf %21, %22 : vector<4x2x128xf32>
    %c0_12 = arith.constant 0 : index
    %c0_13 = arith.constant 0 : index
    %c0_14 = arith.constant 0 : index
    %24 = vector.load %arg8[%c0_12, %c0_13, %c0_14] : memref<4x2x128xf32, #tpu.memory_space<vmem>>, vector<4x2x128xf32>
    tpu.vector_store %arg8[%c0_12, %c0_13, %c0_14], %23 {strides = array<i32>} : memref<4x2x128xf32, #tpu.memory_space<vmem>>, vector<4x2x128xf32>,
    %c0_15 = arith.constant 0 : index
    %c0_16 = arith.constant 0 : index
    %c0_17 = arith.constant 0 : index
    %25 = vector.load %arg9[%c0_15, %c0_16, %c0_17] : memref<4x2x128xf32, #tpu.memory_space<vmem>>, vector<4x2x128xf32>
    %26 = arith.addf %25, %15 : vector<4x2x128xf32>
    %c0_18 = arith.constant 0 : index
    %c0_19 = arith.constant 0 : index
    %c0_20 = arith.constant 0 : index
    %27 = vector.load %arg9[%c0_18, %c0_19, %c0_20] : memref<4x2x128xf32, #tpu.memory_space<vmem>>, vector<4x2x128xf32>
    tpu.vector_store %arg9[%c0_18, %c0_19, %c0_20], %26 {strides = array<i32>} : memref<4x2x128xf32, #tpu.memory_space<vmem>>, vector<4x2x128xf32>,
    %c0_21 = arith.constant 0 : index
    %c0_22 = arith.constant 0 : index
    %c0_23 = arith.constant 0 : index
    %28 = vector.load %arg10[%c0_21, %c0_22, %c0_23] : memref<4x2x128xf32, #tpu.memory_space<vmem>>, vector<4x2x128xf32>
    %29 = arith.addf %28, %20 : vector<4x2x128xf32>
    %c0_24 = arith.constant 0 : index
    %c0_25 = arith.constant 0 : index
    %c0_26 = arith.constant 0 : index
    %30 = vector.load %arg10[%c0_24, %c0_25, %c0_26] : memref<4x2x128xf32, #tpu.memory_space<vmem>>, vector<4x2x128xf32>
    tpu.vector_store %arg10[%c0_24, %c0_25, %c0_26], %29 {strides = array<i32>} : memref<4x2x128xf32, #tpu.memory_space<vmem>>, vector<4x2x128xf32>,
    %c0_i32_27 = arith.constant 0 : i32
    %31 = arith.cmpi eq, %arg2, %c0_i32_27 : i32
    %32 = arith.extui %31 : i1 to i32
    %c0_i32_28 = arith.constant 0 : i32
    %33 = arith.cmpi ne, %32, %c0_i32_28 : i32
    scf.if %33 {
      %c0_29 = arith.constant 0 : index
      %c0_30 = arith.constant 0 : index
      %c0_31 = arith.constant 0 : index
      %34 = vector.load %arg8[%c0_29, %c0_30, %c0_31] : memref<4x2x128xf32, #tpu.memory_space<vmem>>, vector<4x2x128xf32>
      %cst_32 = arith.constant dense<0.000000e+00> : vector<4x128xf32>
      %35 = vector.multi_reduction <add>, %34, %cst_32 [1] : vector<4x2x128xf32> to vector<4x128xf32>
      %c0_33 = arith.constant 0 : index
      %c0_34 = arith.constant 0 : index
      %c0_35 = arith.constant 0 : index
      %36 = vector.load %arg5[%c0_33, %c0_34, %c0_35] : memref<1x4x128xf32, #tpu.memory_space<vmem>>, vector<1x4x128xf32>
      %37 = vector.shape_cast %36 : vector<1x4x128xf32> to vector<4x128xf32>
      %38 = vector.shape_cast %35 : vector<4x128xf32> to vector<1x4x128xf32>
      tpu.vector_store %arg5[%c0_33, %c0_34, %c0_35], %38 {strides = array<i32>} : memref<1x4x128xf32, #tpu.memory_space<vmem>>, vector<1x4x128xf32>,
      %c0_36 = arith.constant 0 : index
      %c0_37 = arith.constant 0 : index
      %c0_38 = arith.constant 0 : index
      %39 = vector.load %arg9[%c0_36, %c0_37, %c0_38] : memref<4x2x128xf32, #tpu.memory_space<vmem>>, vector<4x2x128xf32>
      %cst_39 = arith.constant dense<0.000000e+00> : vector<4x128xf32>
      %40 = vector.multi_reduction <add>, %39, %cst_39 [1] : vector<4x2x128xf32> to vector<4x128xf32>
      %c0_40 = arith.constant 0 : index
      %c0_41 = arith.constant 0 : index
      %c0_42 = arith.constant 0 : index
      %41 = vector.load %arg6[%c0_40, %c0_41, %c0_42] : memref<1x4x128xf32, #tpu.memory_space<vmem>>, vector<1x4x128xf32>
      %42 = vector.shape_cast %41 : vector<1x4x128xf32> to vector<4x128xf32>
      %43 = vector.shape_cast %40 : vector<4x128xf32> to vector<1x4x128xf32>
      tpu.vector_store %arg6[%c0_40, %c0_41, %c0_42], %43 {strides = array<i32>} : memref<1x4x128xf32, #tpu.memory_space<vmem>>, vector<1x4x128xf32>,
      %c0_43 = arith.constant 0 : index
      %c0_44 = arith.constant 0 : index
      %c0_45 = arith.constant 0 : index
      %44 = vector.load %arg10[%c0_43, %c0_44, %c0_45] : memref<4x2x128xf32, #tpu.memory_space<vmem>>, vector<4x2x128xf32>
      %cst_46 = arith.constant dense<0.000000e+00> : vector<4x128xf32>
      %45 = vector.multi_reduction <add>, %44, %cst_46 [1] : vector<4x2x128xf32> to vector<4x128xf32>
      %c0_47 = arith.constant 0 : index
      %c0_48 = arith.constant 0 : index
      %c0_49 = arith.constant 0 : index
      %46 = vector.load %arg7[%c0_47, %c0_48, %c0_49] : memref<1x4x128xf32, #tpu.memory_space<vmem>>, vector<1x4x128xf32>
      %47 = vector.shape_cast %46 : vector<1x4x128xf32> to vector<4x128xf32>
      %48 = vector.shape_cast %45 : vector<4x128xf32> to vector<1x4x128xf32>
      tpu.vector_store %arg7[%c0_47, %c0_48, %c0_49], %48 {strides = array<i32>} : memref<1x4x128xf32, #tpu.memory_space<vmem>>, vector<1x4x128xf32>,
    } else {
    }
    return
  }
  func.func @transform_0(%arg0: i32, %arg1: i32, %arg2: i32) -> (i32, i32, i32, i32) {
    %c1_i32 = arith.constant 1 : i32
    %0 = arith.muli %arg1, %c1_i32 : i32
    %1 = arith.addi %0, %arg2 : i32
    %c0_i32 = arith.constant 0 : i32
    %c0_i32_0 = arith.constant 0 : i32
    %c0_i32_1 = arith.constant 0 : i32
    return %arg0, %c0_i32, %1, %c0_i32_0 : i32, i32, i32, i32
  }
  func.func @transform_1(%arg0: i32, %arg1: i32, %arg2: i32) -> (i32, i32, i32, i32) {
    %c1_i32 = arith.constant 1 : i32
    %0 = arith.muli %arg1, %c1_i32 : i32
    %1 = arith.addi %0, %arg2 : i32
    %c0_i32 = arith.constant 0 : i32
    %c0_i32_0 = arith.constant 0 : i32
    %c0_i32_1 = arith.constant 0 : i32
    return %arg0, %c0_i32, %1, %c0_i32_0 : i32, i32, i32, i32
  }
  func.func @transform_2(%arg0: i32, %arg1: i32, %arg2: i32) -> (i32, i32, i32) {
    %c1_i32 = arith.constant 1 : i32
    %0 = arith.muli %arg0, %c1_i32 : i32
    %1 = arith.addi %0, %arg1 : i32
    %c0_i32 = arith.constant 0 : i32
    %c0_i32_0 = arith.constant 0 : i32
    %c0_i32_1 = arith.constant 0 : i32
    return %1, %c0_i32, %c0_i32_0 : i32, i32, i32
  }
  func.func @transform_3(%arg0: i32, %arg1: i32, %arg2: i32) -> (i32, i32, i32) {
    %c1_i32 = arith.constant 1 : i32
    %0 = arith.muli %arg0, %c1_i32 : i32
    %1 = arith.addi %0, %arg1 : i32
    %c0_i32 = arith.constant 0 : i32
    %c0_i32_0 = arith.constant 0 : i32
    %c0_i32_1 = arith.constant 0 : i32
    return %1, %c0_i32, %c0_i32_0 : i32, i32, i32
  }
  func.func @transform_4(%arg0: i32, %arg1: i32, %arg2: i32) -> (i32, i32, i32) {
    %c1_i32 = arith.constant 1 : i32
    %0 = arith.muli %arg0, %c1_i32 : i32
    %1 = arith.addi %0, %arg1 : i32
    %c0_i32 = arith.constant 0 : i32
    %c0_i32_0 = arith.constant 0 : i32
    %c0_i32_1 = arith.constant 0 : i32
    return %1, %c0_i32, %c0_i32_0 : i32, i32, i32
  }
}

</mosaic_0001>

<bundles_post_ra>
// kernel: dice_loss.1
= control target key start
LH: loop header
LB: loop body
LE: loop exit
PB: predicated region body
PF: predicated region fallthrough
CT: control target
= control target key end

     0   :  { %s798_s15 = smov 0   ;;  %s800_s16 = smov 0   ;;  %s896_s0 = inlined_call_operand.vmem [shape: f32[2,4,2,128], index: 0, kind: input, shape index: {}]   ;;  %s897_s1 = inlined_call_operand.vmem [shape: s32[2,1,2,128], index: 1, kind: input, shape index: {}]   ;;  %s898_s2 = inlined_call_operand.vmem [shape: f32[2,4,128], index: 2, kind: output, shape index: {0}]   ;;  %s899_s3 = inlined_call_operand.vmem [shape: f32[2,4,128], index: 3, kind: output, shape index: {1}]   ;;  %s900_s4 = inlined_call_operand.vmem [shape: f32[2,4,128], index: 4, kind: output, shape index: {2}]  }
   0x1   :  { %s802_s17 = smov 0  }
   0x2 LB: > { %s34_s18 = sadd.s32 1, %s766_s16  ;;  %p699_p0 = scmp.ge.s32.totalorder %s770_s17, 1  ;;  %s770_s17 = sphi %s802_s17, %s15_s17   ;;  %s766_s16 = sphi %s800_s16, %s902_s16   ;;  %s762_s15 = sphi %s798_s15, %s901_s15  }
   0x3   : > { %p36_p1 = scmp.ge.s32.totalorder %s34_s18, 2  ;;  %p219_p2 = scmp.lt.s32.totalorder %s770_s17, 3 }
   0x5   : > { %s904_s18 = smov (%p36_p1, %s34_s18), 0  ;;  %p220_p3 = pnand %p699_p0, %p219_p2 }
   0x6   : > { %p268_p4 = scmp.lt.s32.totalorder (!%p220_p3), %s762_s15, 1 }
   0x7   : > { %223 = sbr.rel (%p220_p3) target bundleno = 101 (0x65), region = 28 }
   0xc   : > { %v772_v0 = vmov 0.0   ;;  %s906_s15 = smov (!%p268_p4, %s762_s15), 1  ;;  %vm325_vm0 = vcmask 1041408   ;;  %vm448_vm5 = vcmask 1041409   ;;  %vm450_vm6 = vcmask 1042434  }
   0xd   : > { %316 = vst [vmem:[#allocation4] sm:$0x3] %v772_v0  ;;  %308 = vst [vmem:[#allocation2] sm:$0x3] %v772_v0  ;;  %s712_s19 = sshll.u32 %s906_s15, 3  ;;  %s702_s20 = sshll.u32 %s906_s15, 1 }
   0xe   : > { %309 = vst [vmem:[#allocation2 + $0x2] sm:$0x3] %v772_v0  ;;  %310 = vst [vmem:[#allocation2 + $0x4] sm:$0x3] %v772_v0  ;;  %s275_s23 = scalar_lea.vmem %s896_s0, %s712_s19  ;;  %s284_s26 = scalar_lea.vmem %s897_s1, %s702_s20  ;;  %vm452_vm7 = vcmask 1043459  }
   0xf   : > { %311 = vst [vmem:[#allocation2 + $0x6] sm:$0x3] %v772_v0  ;;  %312 = vst [vmem:[#allocation3] sm:$0x3] %v772_v0  ;;  %v321_v1 = vld [vmem:[%s275_s23 + $0x2] sm:$0x3] }
  0x10   : > { %313 = vst [vmem:[#allocation3 + $0x2] sm:$0x3] %v772_v0  ;;  %314 = vst [vmem:[#allocation3 + $0x4] sm:$0x3] %v772_v0  ;;  %v322_v2 = vld [vmem:[%s275_s23 + $0x4] sm:$0x3] }
  0x11   : > { %315 = vst [vmem:[#allocation3 + $0x6] sm:$0x3] %v772_v0  ;;  %317 = vst [vmem:[#allocation4 + $0x2] sm:$0x3] %v772_v0  ;;  %v323_v3 = vld [vmem:[%s275_s23 + $0x6] sm:$0x3] }
  0x12   : > { %318 = vst [vmem:[#allocation4 + $0x4] sm:$0x3] %v772_v0  ;;  %319 = vst [vmem:[#allocation4 + $0x6] sm:$0x3] %v772_v0  ;;  %v324_v4 = vld [vmem:[%s284_s26] sm:$0x3] }
  0x13   : > { %v327_v5 = vsel %vm325_vm0, %v321_v1, -inf  ;;  %v328_v6 = vsel %vm325_vm0, %v322_v2, -inf  ;;  %v329_v7 = vsel %vm325_vm0, %v323_v3, -inf  ;;  %vm357_vm1 = vcmp.eq.s32.totalorder %v324_v4, 0  ;;  %v320_v19 = vld [vmem:[%s275_s23] sm:$0x3] }
  0x14   : > { %v331_v8 = vmax.f32 %v328_v6, %v329_v7  ;;  %v397_v9 = vld [vmem:[#allocation4] sm:$0x3]  ;;  %vm358_vm2 = vcmp.eq.s32.totalorder %v324_v4, 1  ;;  %v830_v11 = vsel %vm357_vm1, 1.0, %v772_v0  ;;  %vm359_vm3 = vcmp.eq.s32.totalorder %v324_v4, 2  ;;  %s848_s27 = sshll.u32 %s906_s15, 2 }
  0x15   : > { %v832_v12 = vsel %vm358_vm2, 1.0, %v772_v0  ;;  %vm360_vm4 = vcmp.eq.s32.totalorder %v324_v4, 3  ;;  %v401_v14 = vadd.f32 %v830_v11, %v397_v9  ;;  %v836_v16 = vsel %vm359_vm3, 1.0, %v772_v0  ;;  %s302_s30 = scalar_lea.vmem %s900_s4, %s848_s27  ;;  %s296_s7 = scalar_lea.vmem %s899_s3, %s848_s27 }
  0x16   : > { %v838_v17 = vsel %vm360_vm4, 1.0, %v772_v0  ;;  %v326_v22 = vsel %vm325_vm0, %v320_v19, -inf  ;;  %s290_s10 = scalar_lea.vmem %s898_s2, %s848_s27 }
  0x17   : > { %405 = vst [vmem:[#allocation4] sm:$0x3] %v401_v14  ;;  %v330_v23 = vmax.f32 %v326_v22, %v327_v5  ;;  %v387_v22 = vld [vmem:[#allocation3 + $0x4] sm:$0x3] }
  0x18   : > { %v398_v10 = vld [vmem:[#allocation4 + $0x2] sm:$0x3] }
  0x19   : > { %v399_v13 = vld [vmem:[#allocation4 + $0x4] sm:$0x3]  ;;  %v402_v15 = vadd.f32 %v832_v12, %v398_v10  ;;  %v400_v18 = vld [vmem:[#allocation4 + $0x6] sm:$0x3]  ;;  %v332_v24 = vmax.f32 %v330_v23, %v331_v8  ;;  %v388_v23 = vld [vmem:[#allocation3 + $0x6] sm:$0x3] }
  0x1a   : > { %v403_v20 = vadd.f32 %v836_v16, %v399_v13  ;;  %v404_v21 = vadd.f32 %v838_v17, %v400_v18 }
  0x1b   : > { %406 = vst [vmem:[#allocation4 + $0x2] sm:$0x3] %v402_v15  ;;  %v333_v25 = vsub.f32 %v320_v19, %v332_v24  ;;  %v334_v26 = vsub.f32 %v321_v1, %v332_v24  ;;  %v335_v27 = vsub.f32 %v322_v2, %v332_v24  ;;  %v336_v28 = vsub.f32 %v323_v3, %v332_v24  ;;  %v385_v19 = vld [vmem:[#allocation3] sm:$0x3] }
  0x1c   : > { %407 = vst [vmem:[#allocation4 + $0x4] sm:$0x3] %v403_v20  ;;  %408 = vst [vmem:[#allocation4 + $0x6] sm:$0x3] %v404_v21  ;;  %v386_v21 = vld [vmem:[#allocation3 + $0x2] sm:$0x3] }
  0x1d   : > { %v337_v29 = vmul.f32 1.442695, %v333_v25  ;;  %v339_v30 = vmul.f32 1.442695, %v334_v26  ;;  %v341_v31 = vmul.f32 1.442695, %v335_v27 }
  0x1e   : > { %v343_v32 = vmul.f32 1.442695, %v336_v28  ;;  %v497_v33 = vld [vmem:[#allocation4] sm:$0x3]  ;;  %v369_v28 = vld [vmem:[#allocation2] sm:$0x3] }
  0x1f   : > { %738 = vpow2.f32 %v337_v29  ;;  %v501_v37 = vsel %vm325_vm0, %v497_v33, 0.0  ;;  %v370_v33 = vld [vmem:[#allocation2 + $0x2] sm:$0x3] }
  0x20   : > { %740 = vpow2.f32 %v339_v30  ;;  %v502_v39 = vrot.slane %v501_v37, 4 }
  0x21   : > { %742 = vpow2.f32 %v341_v31 }
  0x22   : > { %v498_v34 = vld [vmem:[#allocation4 + $0x2] sm:$0x3]  ;;  %744 = vpow2.f32 %v343_v32  ;;  %v503_v44 = vadd.f32 %v502_v39, %v501_v37 }
  0x23   : > { %v499_v35 = vld [vmem:[#allocation4 + $0x4] sm:$0x3]  ;;  %v500_v36 = vld [vmem:[#allocation4 + $0x6] sm:$0x3]  ;;  %v508_v38 = vsel %vm325_vm0, %v498_v34, 0.0 }
  0x24   : > { %v509_v40 = vrot.slane %v508_v38, 4  ;;  %v515_v41 = vsel %vm325_vm0, %v499_v35, 0.0  ;;  %v522_v43 = vsel %vm325_vm0, %v500_v36, 0.0  ;;  %v504_v48 = vrot.slane %v503_v44, 2  ;;  %v371_v34 = vld [vmem:[#allocation2 + $0x4] sm:$0x3] }
  0x25   : > { %v516_v42 = vrot.slane %v515_v41, 4  ;;  %v523_v46 = vrot.slane %v522_v43, 4  ;;  %v372_v35 = vld [vmem:[#allocation2 + $0x6] sm:$0x3] }
  0x26   : > { %v510_v45 = vadd.f32 %v509_v40, %v508_v38  ;;  %v505_v52 = vadd.f32 %v504_v48, %v503_v44 }
  0x27   : > { %v517_v47 = vadd.f32 %v516_v42, %v515_v41  ;;  %v524_v50 = vadd.f32 %v523_v46, %v522_v43 }
  0x28   : > { %v511_v49 = vrot.slane %v510_v45, 2  ;;  %v506_v56 = vrot.slane %v505_v52, 1 }
  0x29   : > { %v518_v51 = vrot.slane %v517_v47, 2  ;;  %v525_v54 = vrot.slane %v524_v50, 2 }
  0x2a   : > { %v512_v53 = vadd.f32 %v511_v49, %v510_v45  ;;  %v507_v60 = vadd.f32 %v506_v56, %v505_v52 }
  0x2b   : > { %v519_v55 = vadd.f32 %v518_v51, %v517_v47  ;;  %v526_v58 = vadd.f32 %v525_v54, %v524_v50 }
  0x2c   : > { %v513_v57 = vrot.slane %v512_v53, 1  ;;  %v739_v0 = vpop.eup %738 }
  0x2d   : > { %v520_v59 = vrot.slane %v519_v55, 1  ;;  %v527_v62 = vrot.slane %v526_v58, 1  ;;  %v741_v3 = vpop.eup %740  ;;  %v345_v4 = vsel %vm325_vm0, %v739_v0, 0.0 }
  0x2e   : > { %v514_v61 = vadd.f32 %v513_v57, %v512_v53  ;;  %v743_v6 = vpop.eup %742  ;;  %v346_v7 = vsel %vm325_vm0, %v741_v3, 0.0 }
  0x2f   : > { %v521_v63 = vadd.f32 %v520_v59, %v519_v55  ;;  %v528_v1 = vadd.f32 %v527_v62, %v526_v58  ;;  %v745_v9 = vpop.eup %744  ;;  %v347_v10 = vadd.f32 %v346_v7, %v345_v4  ;;  %v348_v13 = vsel %vm325_vm0, %v743_v6, 0.0 }
  0x30   : > { %v533_v2 = vsel %vm448_vm5, %v514_v61, %v507_v60  ;;  %v350_v14 = vsel %vm325_vm0, %v745_v9, 0.0 }
  0x31   : > { %v534_v5 = vsel %vm450_vm6, %v521_v63, %v533_v2  ;;  %v349_v15 = vadd.f32 %v348_v13, %v347_v10 }
  0x32   : > { %v535_v8 = vsel %vm452_vm7, %v528_v1, %v534_v5 }
  0x33   : > { %537 = vst [vmem:[%s302_s30] sm:$0xf] %v535_v8  ;;  %v351_v18 = vadd.f32 %v350_v14, %v349_v15 }
  0x35   : > { %746 = vrcp.f32 %v351_v18 }
  0x42   : > { %v747_v20 = vpop.eup %746 }
  0x43   : > { %v353_v24 = vmul.f32 %v747_v20, %v739_v0  ;;  %v354_v25 = vmul.f32 %v747_v20, %v741_v3  ;;  %v355_v26 = vmul.f32 %v747_v20, %v743_v6  ;;  %v356_v27 = vmul.f32 %v747_v20, %v745_v9 }
  0x45   : > { %v389_v29 = vadd.f32 %v385_v19, %v353_v24  ;;  %v390_v30 = vadd.f32 %v386_v21, %v354_v25  ;;  %v391_v31 = vadd.f32 %v387_v22, %v355_v26  ;;  %v392_v32 = vadd.f32 %v388_v23, %v356_v27 }
  0x46   : > { %v373_v36 = vmul.f32 %v830_v11, %v353_v24  ;;  %v374_v37 = vmul.f32 %v832_v12, %v354_v25  ;;  %v375_v38 = vmul.f32 %v836_v16, %v355_v26  ;;  %v376_v39 = vmul.f32 %v838_v17, %v356_v27 }
  0x47   : > { %393 = vst [vmem:[#allocation3] sm:$0x3] %v389_v29  ;;  %394 = vst [vmem:[#allocation3 + $0x2] sm:$0x3] %v390_v30 }
  0x48   : > { %395 = vst [vmem:[#allocation3 + $0x4] sm:$0x3] %v391_v31  ;;  %396 = vst [vmem:[#allocation3 + $0x6] sm:$0x3] %v392_v32  ;;  %v377_v40 = vadd.f32 %v373_v36, %v369_v28  ;;  %v378_v41 = vadd.f32 %v374_v37, %v370_v33  ;;  %v379_v42 = vadd.f32 %v375_v38, %v371_v34 }
  0x49   : > { %v380_v43 = vadd.f32 %v376_v39, %v372_v35 }
  0x4a   : > { %381 = vst [vmem:[#allocation2] sm:$0x3] %v377_v40  ;;  %382 = vst [vmem:[#allocation2 + $0x2] sm:$0x3] %v378_v41 }
  0x4b   : > { %383 = vst [vmem:[#allocation2 + $0x4] sm:$0x3] %v379_v42  ;;  %384 = vst [vmem:[#allocation2 + $0x6] sm:$0x3] %v380_v43 }
  0x4e   : > { %v456_v44 = vld [vmem:[#allocation3] sm:$0x3]  ;;  %v457_v11 = vld [vmem:[#allocation3 + $0x2] sm:$0x3] }
  0x4f   : > { %v458_v45 = vld [vmem:[#allocation3 + $0x4] sm:$0x3]  ;;  %v459_v12 = vld [vmem:[#allocation3 + $0x6] sm:$0x3]  ;;  %v460_v16 = vsel %vm325_vm0, %v456_v44, 0.0  ;;  %v467_v17 = vsel %vm325_vm0, %v457_v11, 0.0 }
  0x50   : > { %v474_v46 = vsel %vm325_vm0, %v458_v45, 0.0  ;;  %v461_v47 = vrot.slane %v460_v16, 4  ;;  %v468_v48 = vrot.slane %v467_v17, 4  ;;  %v481_v50 = vsel %vm325_vm0, %v459_v12, 0.0 }
  0x51   : > { %v475_v49 = vrot.slane %v474_v46, 4  ;;  %v482_v51 = vrot.slane %v481_v50, 4  ;;  %v412_v52 = vld [vmem:[#allocation2] sm:$0x3]  ;;  %v413_v53 = vld [vmem:[#allocation2 + $0x2] sm:$0x3] }
  0x52   : > { %v462_v54 = vadd.f32 %v461_v47, %v460_v16  ;;  %v469_v55 = vadd.f32 %v468_v48, %v467_v17  ;;  %v414_v57 = vld [vmem:[#allocation2 + $0x4] sm:$0x3]  ;;  %v415_v58 = vld [vmem:[#allocation2 + $0x6] sm:$0x3]  ;;  %v416_v59 = vsel %vm325_vm0, %v412_v52, 0.0  ;;  %v423_v62 = vsel %vm325_vm0, %v413_v53, 0.0 }
  0x53   : > { %v476_v56 = vadd.f32 %v475_v49, %v474_v46  ;;  %v483_v60 = vadd.f32 %v482_v51, %v481_v50  ;;  %v417_v61 = vrot.slane %v416_v59, 4  ;;  %v430_v63 = vsel %vm325_vm0, %v414_v57, 0.0 }
  0x54   : > { %v463_v0 = vrot.slane %v462_v54, 2  ;;  %v470_v1 = vrot.slane %v469_v55, 2  ;;  %v424_v3 = vrot.slane %v423_v62, 4  ;;  %v431_v6 = vrot.slane %v430_v63, 4 }
  0x55   : > { %v477_v2 = vrot.slane %v476_v56, 2  ;;  %v484_v4 = vrot.slane %v483_v60, 2  ;;  %v418_v5 = vadd.f32 %v417_v61, %v416_v59  ;;  %v437_v7 = vsel %vm325_vm0, %v415_v58, 0.0 }
  0x56   : > { %v464_v8 = vadd.f32 %v463_v0, %v462_v54  ;;  %v471_v9 = vadd.f32 %v470_v1, %v469_v55  ;;  %v425_v13 = vadd.f32 %v424_v3, %v423_v62  ;;  %v432_v18 = vadd.f32 %v431_v6, %v430_v63 }
  0x57   : > { %v478_v10 = vadd.f32 %v477_v2, %v476_v56  ;;  %v485_v14 = vadd.f32 %v484_v4, %v483_v60  ;;  %v419_v15 = vrot.slane %v418_v5, 2  ;;  %v438_v19 = vrot.slane %v437_v7, 4 }
  0x58   : > { %v465_v20 = vrot.slane %v464_v8, 1  ;;  %v472_v21 = vrot.slane %v471_v9, 1  ;;  %v426_v23 = vrot.slane %v425_v13, 2  ;;  %v433_v26 = vrot.slane %v432_v18, 2 }
  0x59   : > { %v479_v22 = vrot.slane %v478_v10, 1  ;;  %v486_v24 = vrot.slane %v485_v14, 1  ;;  %v420_v25 = vadd.f32 %v419_v15, %v418_v5  ;;  %v439_v27 = vadd.f32 %v438_v19, %v437_v7 }
  0x5a   : > { %v466_v28 = vadd.f32 %v465_v20, %v464_v8  ;;  %v473_v29 = vadd.f32 %v472_v21, %v471_v9  ;;  %v427_v31 = vadd.f32 %v426_v23, %v425_v13  ;;  %v434_v33 = vadd.f32 %v433_v26, %v432_v18 }
  0x5b   : > { %v480_v30 = vadd.f32 %v479_v22, %v478_v10  ;;  %v421_v32 = vrot.slane %v420_v25, 1  ;;  %v440_v34 = vrot.slane %v439_v27, 2  ;;  %v487_v35 = vadd.f32 %v486_v24, %v485_v14 }
  0x5c   : > { %v492_v36 = vsel %vm448_vm5, %v473_v29, %v466_v28  ;;  %v428_v37 = vrot.slane %v427_v31, 1  ;;  %v435_v40 = vrot.slane %v434_v33, 1 }
  0x5d   : > { %v493_v38 = vsel %vm450_vm6, %v480_v30, %v492_v36  ;;  %v422_v39 = vadd.f32 %v421_v32, %v420_v25  ;;  %v441_v41 = vadd.f32 %v440_v34, %v439_v27 }
  0x5e   : > { %v494_v42 = vsel %vm452_vm7, %v487_v35, %v493_v38  ;;  %v429_v43 = vadd.f32 %v428_v37, %v427_v31  ;;  %v436_v44 = vadd.f32 %v435_v40, %v434_v33 }
  0x5f   : > { %496 = vst [vmem:[%s296_s7] sm:$0xf] %v494_v42  ;;  %v442_v11 = vrot.slane %v441_v41, 1 }
  0x60   : > { %v449_v45 = vsel %vm448_vm5, %v429_v43, %v422_v39 }
  0x61   : > { %v443_v12 = vadd.f32 %v442_v11, %v441_v41  ;;  %v451_v16 = vsel %vm450_vm6, %v436_v44, %v449_v45 }
  0x63   : > { %v453_v17 = vsel %vm452_vm7, %v443_v12, %v451_v16 }
  0x64   : > { %455 = vst [vmem:[%s290_s10] sm:$0xf] %v453_v17 }
  0x65 PF: > { %s15_s17 = sadd.s32 1, %s770_s17   ;;  %s901_s15 = smov %s766_s16 }
  0x66   : > { %p12_p5 = scmp.ge.s32.totalorder %s15_s17, 4   ;;  %s902_s16 = smov %s904_s18 }
  0x68   :  { %14 = sbr.rel (!%p12_p5) target bundleno = 2 (0x2), region = 93 }

</bundles_post_ra>
